<compile_context>
chip_gen: v5e
topology: v5e:2x2
jax: 0.10.0
libtpu: 0.0.40
codegen_flags: <defaults>
</compile_context>

<pallas_src>
import jax
import jax.numpy as jnp
from jax import lax
from jax.experimental import pallas as pl
from jax.experimental.pallas import tpu as pltpu


# ----------------------------------------------------------------------------
# Kernel A: fused Q / (K,V) projections
# ----------------------------------------------------------------------------
def _qkv_proj_kernel(xq_ref, xkv_ref, wqT_ref, wkvT_ref, q_ref, k_ref, v_ref):
    # xq_ref: (Mq, C), xkv_ref: (Mkv, C), wqT_ref: (C, C) (scale pre-folded),
    # wkvT_ref: (C, 2C);  q_ref: (Mq, C), k_ref / v_ref: (Mkv, C).
    q_ref[...] = jnp.dot(xq_ref[...], wqT_ref[...],
                         preferred_element_type=jnp.float32).astype(q_ref.dtype)
    kv = jnp.dot(xkv_ref[...], wkvT_ref[...],
                 preferred_element_type=jnp.float32)          # (Mkv, 2C)
    C = k_ref.shape[-1]
    k_ref[...] = kv[:, :C].astype(k_ref.dtype)
    v_ref[...] = kv[:, C:].astype(v_ref.dtype)


def qkv_projection(xq2d, xkv2d, wqT, wkvT):
    """qp = xq2d @ (scale*Wq)^T ; [kp | vp] = xkv2d @ [Wk^T | Wv^T], one launch."""
    Mq, C = xq2d.shape
    Mkv = xkv2d.shape[0]
    dt = xq2d.dtype
    # All operands are tiny (KBs) at these shapes -> single-step grid with the
    # full arrays resident in VMEM (full-array blocks are always legal).
    # TODO(synk): row-tile (tm>=128/256) for large Mq / Mkv.
    return pl.pallas_call(
        _qkv_proj_kernel,
        out_shape=(jax.ShapeDtypeStruct((Mq, C), dt),
                   jax.ShapeDtypeStruct((Mkv, C), dt),
                   jax.ShapeDtypeStruct((Mkv, C), dt)),
        grid=(1,),
        in_specs=[
            pl.BlockSpec((Mq, C), lambda i: (0, 0)),
            pl.BlockSpec((Mkv, C), lambda i: (0, 0)),
            pl.BlockSpec((C, C), lambda i: (0, 0)),
            pl.BlockSpec((C, 2 * C), lambda i: (0, 0)),
        ],
        out_specs=(pl.BlockSpec((Mq, C), lambda i: (0, 0)),
                   pl.BlockSpec((Mkv, C), lambda i: (0, 0)),
                   pl.BlockSpec((Mkv, C), lambda i: (0, 0))),
        compiler_params=pltpu.CompilerParams(
            dimension_semantics=("arbitrary",)),
    )(xq2d, xkv2d, wqT, wkvT)


# ----------------------------------------------------------------------------
# Kernel B: attention + output projection (fused)
# ----------------------------------------------------------------------------
def _attn_proj_kernel(q_ref, k_ref, v_ref, wpT_ref, bp_ref, o_ref):
    # q_ref: (tq, B*C)  (qk scale already folded into Wq in prepare_params)
    # k_ref / v_ref: (B*C, n), wpT_ref: (B*C, B*C) block-diagonal,
    # bp_ref: (1, B*C), o_ref: (tq, B*C).
    s = jnp.dot(q_ref[...], k_ref[...],
                preferred_element_type=jnp.float32)              # (tq, n)
    m = jnp.max(s, axis=-1, keepdims=True)
    e = jnp.exp(s - m)
    # Reciprocal-multiply on the EUP instead of a VALU divide.
    p = e * pl.reciprocal(jnp.sum(e, axis=-1, keepdims=True), approx=True)
    # attn_drop(p=0.0) is the identity in eval mode.

    # x = attn @ v.T WITHOUT materializing the transpose: contract the last
    # (n) dim of both operands (standard MXU-friendly form).
    x = lax.dot_general(p, v_ref[...], (((1,), (1,)), ((), ())),
                        preferred_element_type=jnp.float32)      # (tq, B*C)

    # Output projection on the re-interpreted (tq, B*C) slab: a single MXU
    # matmul against the pre-built block-diagonal Wp^T (each C-wide lane
    # segment is one (b, s) row of the reference's (B, N, C) tensor).  The
    # result already has the final row-major layout, so the wrapper reshape
    # after the call is a pure flat-buffer reinterpretation.
    o_ref[...] = (jnp.dot(x, wpT_ref[...], preferred_element_type=jnp.float32)
                  + bp_ref[...]).astype(o_ref.dtype)


def attention_output(q_r, k_r, v_r, wpT_bd, bp_bd, *, tq=256):
    """softmax(q_r @ k_r) @ v_r.T, then block-diag output projection, fused."""
    N, BC = q_r.shape
    n = k_r.shape[1]
    if N % tq != 0:
        tq = N  # single full tile (block == full array is always legal)
    return pl.pallas_call(
        _attn_proj_kernel,
        out_shape=jax.ShapeDtypeStruct((N, BC), q_r.dtype),
        grid=(N // tq,),
        in_specs=[
            pl.BlockSpec((tq, BC), lambda i: (i, 0)),   # query-row tile
            pl.BlockSpec((BC, n), lambda i: (0, 0)),    # K resident
            pl.BlockSpec((BC, n), lambda i: (0, 0)),    # V resident
            pl.BlockSpec((BC, BC), lambda i: (0, 0)),   # block-diag Wp^T resident
            pl.BlockSpec((1, BC), lambda i: (0, 0)),    # tiled bias resident
        ],
        out_specs=pl.BlockSpec((tq, BC), lambda i: (i, 0)),
        compiler_params=pltpu.CompilerParams(
            dimension_semantics=("parallel",)),
    )(q_r, k_r, v_r, wpT_bd, bp_bd)


# ----------------------------------------------------------------------------
# Parameter preparation (one-time, outside the per-call path)
# ----------------------------------------------------------------------------
def prepare_params(params, batch_size, num_heads=4, qk_scale=None):
    """One-time prep mirroring the module constructor.

    PyTorch-style (out, in) weights -> pre-transposed (in, out); Wk / Wv fused
    into one (C, 2C) matrix; qk scale folded into Wq (q only feeds the scores);
    Wp^T expanded block-diagonally over the batch + bias tiled, so the output
    projection of the (N, B*C) activation is a single matmul.
    """
    wq = jnp.asarray(params["wq"])
    wk = jnp.asarray(params["wk"])
    wv = jnp.asarray(params["wv"])
    wp = jnp.asarray(params["wp"])
    bp = jnp.asarray(params["bp"])
    C = wq.shape[0]
    head_dim = C // num_heads
    scale = float(qk_scale) if qk_scale is not None else head_dim ** (-0.5)

    wqT = wq.T * scale                                   # scale folded (exact)
    wkvT = jnp.concatenate([wk.T, wv.T], axis=1)         # (C, 2C)
    # TODO(synk): per-C-segment projection fallback for very large B (the
    # block-diagonal weight is O((B*C)^2) VMEM and B x redundant MXU flops).
    wpT_bd = jnp.kron(jnp.eye(batch_size, dtype=wp.dtype), wp.T)   # (B*C, B*C)
    bp_bd = jnp.tile(bp, batch_size).reshape(1, -1)                # (1, B*C)
    return {"wqT": wqT, "wkvT": wkvT, "wpT_bd": wpT_bd, "bp_bd": bp_bd}


# ----------------------------------------------------------------------------
# CVAttention forward (Pallas kernels + contiguous reshape glue)
# ----------------------------------------------------------------------------
def cv_attention(xq, xkv, prepared):
    B, N, C = xq.shape
    Bk, n, Ck = xkv.shape
    assert B == Bk and C == Ck
    assert prepared["wpT_bd"].shape[0] == B * C  # prepared for this batch size
    # NOTE: the reference attention deliberately mixes batch and channel via
    # the flat reshapes below.  Do NOT "fix" this into per-batch MHA.

    # Kernel A: fused Q / (K,V) projections (scale pre-folded into Wq).
    qp, kp, vp = qkv_projection(xq.reshape(B * N, C), xkv.reshape(B * n, C),
                                prepared["wqT"], prepared["wkvT"])

    # Reference module's row-major flat-buffer re-interpretations.
    q_r = qp.reshape(N, B * C)
    k_r = kp.reshape(B * C, n)
    v_r = vp.reshape(B * C, n)

    # Kernel B: attention + output projection; result already lands in the
    # final row-major layout, so this last reshape is a flat reinterpretation.
    y = attention_output(q_r, k_r, v_r, prepared["wpT_bd"], prepared["bp_bd"])
    return y.reshape(B, N, C)


# ----------------------------------------------------------------------------
# Pure-JAX reference mirroring the PyTorch forward exactly
# ----------------------------------------------------------------------------
def cv_attention_ref(xq, xkv, params, num_heads=4):
    B, N, C = xq.shape
    _, n, _ = xkv.shape
    scale = (C // num_heads) ** (-0.5)
    q = (xq @ params["wq"].T).reshape(N, -1)
    k = (xkv @ params["wk"].T).reshape(-1, n)
    v = (xkv @ params["wv"].T).reshape(-1, n)
    attn = jax.nn.softmax((q @ k) * scale, axis=-1)
    x = (attn @ v.T).reshape(B, N, C)
    return x @ params["wp"].T + params["bp"]


# ----------------------------------------------------------------------------
if __name__ == "__main__":
    B, N, n, C, heads = 2, 8, 8, 32, 4

    key = jax.random.PRNGKey(0)
    k_xq, k_xkv, k_wq, k_wk, k_wv, k_wp, k_bp = jax.random.split(key, 7)

    xq = jax.random.normal(k_xq, (B, N, C), jnp.float32)
    xkv = jax.random.normal(k_xkv, (B, n, C), jnp.float32)

    # Deterministic nn.Linear-style init: U(-1/sqrt(dim), 1/sqrt(dim)).
    bound = 1.0 / (C ** 0.5)
    params = {
        "wq": jax.random.uniform(k_wq, (C, C), jnp.float32, -bound, bound),
        "wk": jax.random.uniform(k_wk, (C, C), jnp.float32, -bound, bound),
        "wv": jax.random.uniform(k_wv, (C, C), jnp.float32, -bound, bound),
        "wp": jax.random.uniform(k_wp, (C, C), jnp.float32, -bound, bound),
        "bp": jax.random.uniform(k_bp, (C,), jnp.float32, -bound, bound),
    }

    prepared = prepare_params(params, batch_size=B, num_heads=heads)

    fwd = jax.jit(cv_attention)
    out = fwd(xq, xkv, prepared)
    out = jax.block_until_ready(out)

    ref = cv_attention_ref(xq, xkv, params, num_heads=heads)
    # Tolerance accounts for the approximate EUP reciprocal in the softmax.
    if not jnp.allclose(out, ref, atol=2e-3, rtol=2e-3):
        raise AssertionError("Pallas CVAttention does not match JAX reference")

    print("KERNEL_OK")
</pallas_src>

<mosaic_0001>
module attributes {stable_mosaic.version = 11 : i64} {
  func.func @_qkv_proj_kernel(%arg0: i32, %arg1: memref<16x32xf32, #tpu.memory_space<vmem>>, %arg2: memref<16x32xf32, #tpu.memory_space<vmem>>, %arg3: memref<32x32xf32, #tpu.memory_space<vmem>>, %arg4: memref<32x64xf32, #tpu.memory_space<vmem>>, %arg5: memref<16x32xf32, #tpu.memory_space<vmem>>, %arg6: memref<16x32xf32, #tpu.memory_space<vmem>>, %arg7: memref<16x32xf32, #tpu.memory_space<vmem>>) attributes {dimension_semantics = [#tpu.dimension_semantics<arbitrary>], iteration_bounds = array<i64: 1>, scalar_prefetch = 0 : i64, scratch_operands = 0 : i64, tpu.core_type = #tpu.core_type<tc>, window_params = [{pipeline_mode = #tpu.pipeline_mode<synchronous>, transform_indices = @transform_0, window_bounds = array<i64: 16, 32>}, {pipeline_mode = #tpu.pipeline_mode<synchronous>, transform_indices = @transform_1, window_bounds = array<i64: 16, 32>}, {pipeline_mode = #tpu.pipeline_mode<synchronous>, transform_indices = @transform_2, window_bounds = array<i64: 32, 32>}, {pipeline_mode = #tpu.pipeline_mode<synchronous>, transform_indices = @transform_3, window_bounds = array<i64: 32, 64>}, {pipeline_mode = #tpu.pipeline_mode<synchronous>, transform_indices = @transform_4, window_bounds = array<i64: 16, 32>}, {pipeline_mode = #tpu.pipeline_mode<synchronous>, transform_indices = @transform_5, window_bounds = array<i64: 16, 32>}, {pipeline_mode = #tpu.pipeline_mode<synchronous>, transform_indices = @transform_6, window_bounds = array<i64: 16, 32>}]} {
    %c0 = arith.constant 0 : index
    %c0_0 = arith.constant 0 : index
    %0 = vector.load %arg1[%c0, %c0_0] : memref<16x32xf32, #tpu.memory_space<vmem>>, vector<16x32xf32>
    %c0_1 = arith.constant 0 : index
    %c0_2 = arith.constant 0 : index
    %1 = vector.load %arg3[%c0_1, %c0_2] : memref<32x32xf32, #tpu.memory_space<vmem>>, vector<32x32xf32>
    %cst = arith.constant dense<0.000000e+00> : vector<16x32xf32>
    %2 = tpu.matmul %0, %1, %cst {dimension_numbers = #tpu.dot_dimension_numbers<[1], [0], [0], [1], [0, 0, 1, 1], [], []>} : vector<16x32xf32>, vector<32x32xf32>, vector<16x32xf32> -> vector<16x32xf32>
    %c0_3 = arith.constant 0 : index
    %c0_4 = arith.constant 0 : index
    %3 = vector.load %arg5[%c0_3, %c0_4] : memref<16x32xf32, #tpu.memory_space<vmem>>, vector<16x32xf32>
    tpu.vector_store %arg5[%c0_3, %c0_4], %2 {strides = array<i32>} : memref<16x32xf32, #tpu.memory_space<vmem>>, vector<16x32xf32>,
    %c0_5 = arith.constant 0 : index
    %c0_6 = arith.constant 0 : index
    %4 = vector.load %arg2[%c0_5, %c0_6] : memref<16x32xf32, #tpu.memory_space<vmem>>, vector<16x32xf32>
    %c0_7 = arith.constant 0 : index
    %c0_8 = arith.constant 0 : index
    %5 = vector.load %arg4[%c0_7, %c0_8] : memref<32x64xf32, #tpu.memory_space<vmem>>, vector<32x64xf32>
    %cst_9 = arith.constant dense<0.000000e+00> : vector<16x64xf32>
    %6 = tpu.matmul %4, %5, %cst_9 {dimension_numbers = #tpu.dot_dimension_numbers<[1], [0], [0], [1], [0, 0, 1, 1], [], []>} : vector<16x32xf32>, vector<32x64xf32>, vector<16x64xf32> -> vector<16x64xf32>
    %7 = vector.extract_strided_slice %6 {offsets = [0, 0], sizes = [16, 32], strides = [1, 1]} : vector<16x64xf32> to vector<16x32xf32>
    %c0_10 = arith.constant 0 : index
    %c0_11 = arith.constant 0 : index
    %8 = vector.load %arg6[%c0_10, %c0_11] : memref<16x32xf32, #tpu.memory_space<vmem>>, vector<16x32xf32>
    tpu.vector_store %arg6[%c0_10, %c0_11], %7 {strides = array<i32>} : memref<16x32xf32, #tpu.memory_space<vmem>>, vector<16x32xf32>,
    %9 = vector.extract_strided_slice %6 {offsets = [0, 32], sizes = [16, 32], strides = [1, 1]} : vector<16x64xf32> to vector<16x32xf32>
    %c0_12 = arith.constant 0 : index
    %c0_13 = arith.constant 0 : index
    %10 = vector.load %arg7[%c0_12, %c0_13] : memref<16x32xf32, #tpu.memory_space<vmem>>, vector<16x32xf32>
    tpu.vector_store %arg7[%c0_12, %c0_13], %9 {strides = array<i32>} : memref<16x32xf32, #tpu.memory_space<vmem>>, vector<16x32xf32>,
    return
  }
  func.func @transform_0(%arg0: i32) -> (i32, i32) {
    %c0_i32 = arith.constant 0 : i32
    %c0_i32_0 = arith.constant 0 : i32
    %c0_i32_1 = arith.constant 0 : i32
    return %c0_i32, %c0_i32_0 : i32, i32
  }
  func.func @transform_1(%arg0: i32) -> (i32, i32) {
    %c0_i32 = arith.constant 0 : i32
    %c0_i32_0 = arith.constant 0 : i32
    %c0_i32_1 = arith.constant 0 : i32
    return %c0_i32, %c0_i32_0 : i32, i32
  }
  func.func @transform_2(%arg0: i32) -> (i32, i32) {
    %c0_i32 = arith.constant 0 : i32
    %c0_i32_0 = arith.constant 0 : i32
    %c0_i32_1 = arith.constant 0 : i32
    return %c0_i32, %c0_i32_0 : i32, i32
  }
  func.func @transform_3(%arg0: i32) -> (i32, i32) {
    %c0_i32 = arith.constant 0 : i32
    %c0_i32_0 = arith.constant 0 : i32
    %c0_i32_1 = arith.constant 0 : i32
    return %c0_i32, %c0_i32_0 : i32, i32
  }
  func.func @transform_4(%arg0: i32) -> (i32, i32) {
    %c0_i32 = arith.constant 0 : i32
    %c0_i32_0 = arith.constant 0 : i32
    %c0_i32_1 = arith.constant 0 : i32
    return %c0_i32, %c0_i32_0 : i32, i32
  }
  func.func @transform_5(%arg0: i32) -> (i32, i32) {
    %c0_i32 = arith.constant 0 : i32
    %c0_i32_0 = arith.constant 0 : i32
    %c0_i32_1 = arith.constant 0 : i32
    return %c0_i32, %c0_i32_0 : i32, i32
  }
  func.func @transform_6(%arg0: i32) -> (i32, i32) {
    %c0_i32 = arith.constant 0 : i32
    %c0_i32_0 = arith.constant 0 : i32
    %c0_i32_1 = arith.constant 0 : i32
    return %c0_i32, %c0_i32_0 : i32, i32
  }
}

module attributes {stable_mosaic.version = 11 : i64} {
  func.func @_attn_proj_kernel(%arg0: i32, %arg1: memref<8x64xf32, #tpu.memory_space<vmem>>, %arg2: memref<64x8xf32, #tpu.memory_space<vmem>>, %arg3: memref<64x8xf32, #tpu.memory_space<vmem>>, %arg4: memref<64x64xf32, #tpu.memory_space<vmem>>, %arg5: memref<1x64xf32, #tpu.memory_space<vmem>>, %arg6: memref<8x64xf32, #tpu.memory_space<vmem>>) attributes {dimension_semantics = [#tpu.dimension_semantics<parallel>], iteration_bounds = array<i64: 1>, scalar_prefetch = 0 : i64, scratch_operands = 0 : i64, tpu.core_type = #tpu.core_type<tc>, window_params = [{transform_indices = @transform_0, window_bounds = array<i64: 8, 64>}, {pipeline_mode = #tpu.pipeline_mode<synchronous>, transform_indices = @transform_1, window_bounds = array<i64: 64, 8>}, {pipeline_mode = #tpu.pipeline_mode<synchronous>, transform_indices = @transform_2, window_bounds = array<i64: 64, 8>}, {pipeline_mode = #tpu.pipeline_mode<synchronous>, transform_indices = @transform_3, window_bounds = array<i64: 64, 64>}, {pipeline_mode = #tpu.pipeline_mode<synchronous>, transform_indices = @transform_4, window_bounds = array<i64: 1, 64>}, {transform_indices = @transform_5, window_bounds = array<i64: 8, 64>}]} {
    %c0 = arith.constant 0 : index
    %c0_0 = arith.constant 0 : index
    %0 = vector.load %arg1[%c0, %c0_0] : memref<8x64xf32, #tpu.memory_space<vmem>>, vector<8x64xf32>
    %c0_1 = arith.constant 0 : index
    %c0_2 = arith.constant 0 : index
    %1 = vector.load %arg2[%c0_1, %c0_2] : memref<64x8xf32, #tpu.memory_space<vmem>>, vector<64x8xf32>
    %cst = arith.constant dense<0.000000e+00> : vector<8x8xf32>
    %2 = tpu.matmul %0, %1, %cst {dimension_numbers = #tpu.dot_dimension_numbers<[1], [0], [0], [1], [0, 0, 1, 1], [], []>} : vector<8x64xf32>, vector<64x8xf32>, vector<8x8xf32> -> vector<8x8xf32>
    %cst_3 = arith.constant dense<0xFF800000> : vector<8xf32>
    %3 = vector.multi_reduction <maximumf>, %2, %cst_3 [1] : vector<8x8xf32> to vector<8xf32>
    %4 = vector.shape_cast %3 : vector<8xf32> to vector<8x1xf32>
    %5 = vector.broadcast %4 : vector<8x1xf32> to vector<8x8xf32>
    %6 = arith.subf %2, %5 : vector<8x8xf32>
    %7 = math.exp %6 : vector<8x8xf32>
    %cst_4 = arith.constant dense<0.000000e+00> : vector<8xf32>
    %8 = vector.multi_reduction <add>, %7, %cst_4 [1] : vector<8x8xf32> to vector<8xf32>
    %9 = vector.shape_cast %8 : vector<8xf32> to vector<8x1xf32>
    %10 = tpu.reciprocal %9 {approx = true} : vector<8x1xf32> -> vector<8x1xf32>
    %11 = vector.broadcast %10 : vector<8x1xf32> to vector<8x8xf32>
    %12 = arith.mulf %7, %11 : vector<8x8xf32>
    %c0_5 = arith.constant 0 : index
    %c0_6 = arith.constant 0 : index
    %13 = vector.load %arg3[%c0_5, %c0_6] : memref<64x8xf32, #tpu.memory_space<vmem>>, vector<64x8xf32>
    %cst_7 = arith.constant dense<0.000000e+00> : vector<8x64xf32>
    %14 = tpu.matmul %12, %13, %cst_7 {dimension_numbers = #tpu.dot_dimension_numbers<[1], [1], [0], [0], [0, 0, 1, 0], [], []>} : vector<8x8xf32>, vector<64x8xf32>, vector<8x64xf32> -> vector<8x64xf32>
    %c0_8 = arith.constant 0 : index
    %c0_9 = arith.constant 0 : index
    %15 = vector.load %arg4[%c0_8, %c0_9] : memref<64x64xf32, #tpu.memory_space<vmem>>, vector<64x64xf32>
    %cst_10 = arith.constant dense<0.000000e+00> : vector<8x64xf32>
    %16 = tpu.matmul %14, %15, %cst_10 {dimension_numbers = #tpu.dot_dimension_numbers<[1], [0], [0], [1], [0, 0, 1, 1], [], []>} : vector<8x64xf32>, vector<64x64xf32>, vector<8x64xf32> -> vector<8x64xf32>
    %c0_11 = arith.constant 0 : index
    %c0_12 = arith.constant 0 : index
    %17 = vector.load %arg5[%c0_11, %c0_12] : memref<1x64xf32, #tpu.memory_space<vmem>>, vector<1x64xf32>
    %18 = vector.broadcast %17 : vector<1x64xf32> to vector<8x64xf32>
    %19 = arith.addf %16, %18 : vector<8x64xf32>
    %c0_13 = arith.constant 0 : index
    %c0_14 = arith.constant 0 : index
    %20 = vector.load %arg6[%c0_13, %c0_14] : memref<8x64xf32, #tpu.memory_space<vmem>>, vector<8x64xf32>
    tpu.vector_store %arg6[%c0_13, %c0_14], %19 {strides = array<i32>} : memref<8x64xf32, #tpu.memory_space<vmem>>, vector<8x64xf32>,
    return
  }
  func.func @transform_0(%arg0: i32) -> (i32, i32) {
    %c0_i32 = arith.constant 0 : i32
    %c0_i32_0 = arith.constant 0 : i32
    return %arg0, %c0_i32 : i32, i32
  }
  func.func @transform_1(%arg0: i32) -> (i32, i32) {
    %c0_i32 = arith.constant 0 : i32
    %c0_i32_0 = arith.constant 0 : i32
    %c0_i32_1 = arith.constant 0 : i32
    return %c0_i32, %c0_i32_0 : i32, i32
  }
  func.func @transform_2(%arg0: i32) -> (i32, i32) {
    %c0_i32 = arith.constant 0 : i32
    %c0_i32_0 = arith.constant 0 : i32
    %c0_i32_1 = arith.constant 0 : i32
    return %c0_i32, %c0_i32_0 : i32, i32
  }
  func.func @transform_3(%arg0: i32) -> (i32, i32) {
    %c0_i32 = arith.constant 0 : i32
    %c0_i32_0 = arith.constant 0 : i32
    %c0_i32_1 = arith.constant 0 : i32
    return %c0_i32, %c0_i32_0 : i32, i32
  }
  func.func @transform_4(%arg0: i32) -> (i32, i32) {
    %c0_i32 = arith.constant 0 : i32
    %c0_i32_0 = arith.constant 0 : i32
    %c0_i32_1 = arith.constant 0 : i32
    return %c0_i32, %c0_i32_0 : i32, i32
  }
  func.func @transform_5(%arg0: i32) -> (i32, i32) {
    %c0_i32 = arith.constant 0 : i32
    %c0_i32_0 = arith.constant 0 : i32
    return %arg0, %c0_i32 : i32, i32
  }
}

</mosaic_0001>

<bundles_post_ra>
// kernel: cv_attention.2
= control target key start
LH: loop header
LB: loop body
LE: loop exit
PB: predicated region body
PF: predicated region fallthrough
CT: control target
= control target key end

     0   :  { %12 = vsyncpa [#allocation3], 0  ;;  %s386_s0 = inlined_call_operand.hbm [shape: f32[16,32], index: 0, kind: input, shape index: {}]   ;;  %s387_s1 = inlined_call_operand.hbm [shape: f32[16,32], index: 1, kind: input, shape index: {}]   ;;  %s388_s2 = inlined_call_operand.hbm [shape: f32[32,32], index: 2, kind: input, shape index: {}]   ;;  %s389_s3 = inlined_call_operand.hbm [shape: f32[32,64], index: 3, kind: input, shape index: {}]   ;;  %s390_s4 = inlined_call_operand.vmem [shape: f32[16,32], index: 4, kind: output, shape index: {0}]   ;;  %s391_s5 = inlined_call_operand.vmem [shape: f32[16,32], index: 5, kind: output, shape index: {1}]   ;;  %s392_s6 = inlined_call_operand.vmem [shape: f32[16,32], index: 6, kind: output, shape index: {2}]  }
   0x1   :  { %13 = vsyncpa [#allocation5], 0 }
   0x2   :  { %14 = vsyncpa [#allocation8], 0  ;;  %s32_s23 = sshll.u32 %s387_s1, 4  ;;  %s304_s24 = smov [#allocation4]   ;;  %s33_s23 = int_to_ptr.hbm [resolvable:$true] %s32_s23 }
   0x3   :  { %s34_s25 = sshll.u32 %s304_s24, 4  ;;  %s19_s28 = sshll.u32 %s386_s0, 4  ;;  %s35_s25 = int_to_ptr.vmem [resolvable:$true] %s34_s25  ;;  %s20_s28 = int_to_ptr.hbm [resolvable:$true] %s19_s28 }
   0x4   :  { %s305_s29 = smov 128   ;;  %s306_s30 = smov 8  }
   0x5   :  { %40 = dma.hbm_to_vmem [thread:$0]  %s33_s23, 256, %s35_s25, [#allocation5], %s305_s29, %s305_s29, %s306_s30  }
   0x6   :  { %s307_s7 = smov [#allocation2]   ;;  %s45_s11 = sshll.u32 %s388_s2, 4  ;;  %s46_s11 = int_to_ptr.hbm [resolvable:$true] %s45_s11 }
   0x7   :  { %s21_s8 = sshll.u32 %s307_s7, 4  ;;  %s58_s13 = sshll.u32 %s389_s3, 4  ;;  %s22_s8 = int_to_ptr.vmem [resolvable:$true] %s21_s8  ;;  %s59_s13 = int_to_ptr.hbm [resolvable:$true] %s58_s13 }
   0x8   :  { %27 = dma.hbm_to_vmem [thread:$0]  %s20_s28, 256, %s22_s8, [#allocation3], %s305_s29, %s305_s29, %s306_s30  }
   0x9   :  { %s308_s14 = smov [#allocation6]   ;;  %s309_s0 = smov [#allocation7]  }
   0xa   :  { %s47_s15 = sshll.u32 %s308_s14, 4  ;;  %s60_s16 = sshll.u32 %s309_s0, 4  ;;  %s48_s15 = int_to_ptr.vmem [resolvable:$true] %s47_s15  ;;  %s61_s16 = int_to_ptr.vmem [resolvable:$true] %s60_s16 }
   0xb   :  { %53 = dma.hbm_to_vmem [thread:$0]  %s46_s11, 512, %s48_s15, [#allocation5], %s305_s29, %s305_s29, %s306_s30  }
   0xc   :  { %66 = dma.hbm_to_vmem [thread:$0]  %s59_s13, 512, %s61_s16, [#allocation8], %s305_s29, %s305_s29, %s306_s30  }
   0xd   :  { %298 = dma.done.wait [#allocation3], 256  }
   0xe   :  { %299 = vsyncadd [#allocation3], 4294967040 }
   0xf   :  { %300 = dma.done.wait [#allocation5], 768  }
  0x10   :  { %301 = vsyncadd [#allocation5], 4294966528 }
  0x11   :  { %302 = dma.done.wait [#allocation8], 512  }
  0x12   :  { %303 = vsyncadd [#allocation8], 4294966784  ;;  %v126_v0 = vld [vmem:[#allocation7 + $0x18] sm:$0xff]  ;;  %v125_v1 = vld [vmem:[#allocation7 + $0x10] sm:$0xff]  ;;  %vm89_vm0 = vcmask 261120   ;;  %s310_s17 = smov 96  }
  0x13   :  { %145 = vmatpush.msra.mxu1 %v126_v0  ;;  %191 = vmatpush.msra.mxu3 %v126_v0  ;;  %v124_v2 = vld [vmem:[#allocation7 + $0x8] sm:$0xff]  ;;  %v88_v3 = vld [vmem:[#allocation6 + $0x18] sm:$0xff]  ;;  %v87_v4 = vld [vmem:[#allocation6 + $0x10] sm:$0xff] }
  0x14   :  { %v123_v5 = vld [vmem:[#allocation7] sm:$0xff]  ;;  %187 = vmatpush.msra.mxu2 %v88_v3  ;;  %108 = vmatpush.msra.mxu0 %v88_v3  ;;  %v121_v6 = vld [vmem:[#allocation4] sm:$0xff]  ;;  %v122_v7 = vld [vmem:[#allocation4 + $0x8] sm:$0xff] }
  0x15   :  { %146 = vmatpush.msra.mxu1 %v125_v1  ;;  %192 = vmatpush.msra.mxu3 %v125_v1  ;;  %v86_v8 = vld [vmem:[#allocation6 + $0x8] sm:$0xff]  ;;  %v85_v9 = vld [vmem:[#allocation6] sm:$0xff] }
  0x16   :  { %188 = vmatpush.msra.mxu2 %v87_v4  ;;  %109 = vmatpush.msra.mxu0 %v87_v4  ;;  %v84_v10 = vld [vmem:[#allocation2 + $0x8] sm:$0xff]  ;;  %v83_v11 = vld [vmem:[#allocation2] sm:$0xff] }
  0x17   :  { %147 = vmatpush.msra.mxu1 %v124_v2  ;;  %193 = vmatpush.msra.mxu3 %v124_v2 }
  0x18   :  { %189 = vmatpush.msra.mxu2 %v86_v8  ;;  %110 = vmatpush.msra.mxu0 %v86_v8 }
  0x19   :  { %148 = vmatpush.msra.mxu1 %v123_v5  ;;  %194 = vmatpush.msra.mxu3 %v123_v5 }
  0x1a   :  { %185 = vmatmul.msk.f32.vlgmr.msra.gmra.mxu1 %vm89_vm0, %v121_v6  ;;  %186 = vmatmul.msk.f32.vlgmr.msra.gmra.mxu3 %vm89_vm0, %v122_v7 }
  0x1b   :  { %190 = vmatpush.msra.mxu2 %v85_v9  ;;  %111 = vmatpush.msra.mxu0 %v85_v9 }
  0x1c   :  { %184 = vmatmul.msk.f32.vlgmr.msra.gmra.mxu2 %vm89_vm0, %v84_v10  ;;  %183 = vmatmul.msk.f32.vlgmr.msra.gmra.mxu0 %vm89_vm0, %v83_v11 }
  0x97   :  { %v150_v12 = vpop.f32.mrf.mxu1 }
  0x98   :  { %156 = vst.msk [vmem:[%s391_s5] sm:$0xff] %vm89_vm0, %v150_v12  ;;  %160 = vrot.lane.b32.xlu0 %v150_v12, %s310_s17 }
  0x99   :  { %v113_v14 = vpop.f32.mrf.mxu0 }
  0x9a   :  { %119 = vst.msk [vmem:[%s390_s4] sm:$0xff] %vm89_vm0, %v113_v14 }
  0x9d   :  { %v153_v13 = vpop.f32.mrf.mxu3 }
  0x9e   :  { %157 = vst.msk [vmem:[%s391_s5 + $0x8] sm:$0xff] %vm89_vm0, %v153_v13 }
  0x9f   :  { %v116_v15 = vpop.f32.mrf.mxu2 }
  0xa0   :  { %162 = vrot.lane.b32.xlu0 %v153_v13, %s310_s17  ;;  %120 = vst.msk [vmem:[%s390_s4 + $0x8] sm:$0xff] %vm89_vm0, %v116_v15 }
 0x10a   :  { %v161_v16 = vpop.permute.xlu0 %160 }
 0x10b   :  { %166 = vst.msk [vmem:[%s392_s6] sm:$0xff] %vm89_vm0, %v161_v16 }
 0x112   :  { %v163_v17 = vpop.permute.xlu0 %162 }
 0x113   :  { %167 = vst.msk [vmem:[%s392_s6 + $0x8] sm:$0xff] %vm89_vm0, %v163_v17 }
 0x114   :  { %180 = vsyncpa [#allocation3], 1 }
 0x115   :  { %181 = vsyncpa [#allocation5], 1 }
 0x116   :  { %182 = vsyncpa [#allocation8], 1 }

// kernel: cv_attention.3
= control target key start
LH: loop header
LB: loop body
LE: loop exit
PB: predicated region body
PF: predicated region fallthrough
CT: control target
= control target key end

     0   :  { %vm29_vm0 = vcmask 523264   ;;  %vm53_vm1 = vcmask 64512   ;;  %s301_s1 = inlined_call_operand.vmem [shape: f32[64,8], index: 1, kind: input, shape index: {}]   ;;  %s302_s0 = inlined_call_operand.vmem [shape: f32[8,64], index: 0, kind: input, shape index: {}]   ;;  %s303_s2 = inlined_call_operand.vmem [shape: f32[64,8], index: 2, kind: input, shape index: {}]   ;;  %s304_s3 = inlined_call_operand.vmem [shape: f32[64,64], index: 3, kind: input, shape index: {}]   ;;  %s305_s4 = inlined_call_operand.vmem [shape: f32[1,64], index: 4, kind: input, shape index: {}]   ;;  %s306_s5 = inlined_call_operand.vmem [shape: f32[8,64], index: 5, kind: output, shape index: {}]  }
   0x1   :  { %v28_v0 = vld [vmem:[%s301_s1 + $0x38] sm:$0xff]  ;;  %v27_v1 = vld [vmem:[%s301_s1 + $0x30] sm:$0xff]  ;;  %v26_v2 = vld [vmem:[%s301_s1 + $0x28] sm:$0xff] }
   0x2   :  { %41 = vmatpush.msra.mxu0 %v28_v0  ;;  %v25_v3 = vld [vmem:[%s301_s1 + $0x20] sm:$0xff]  ;;  %v24_v4 = vld [vmem:[%s301_s1 + $0x18] sm:$0xff]  ;;  %v23_v5 = vld [vmem:[%s301_s1 + $0x10] sm:$0xff] }
   0x3   :  { %v22_v6 = vld [vmem:[%s301_s1 + $0x8] sm:$0xff]  ;;  %v21_v7 = vld [vmem:[%s301_s1] sm:$0xff]  ;;  %v72_v11 = vld [vmem:[%s303_s2 + $0x38] sm:$0xff] }
   0x4   :  { %42 = vmatpush.msra.mxu0 %v27_v1  ;;  %v20_v8 = vld [vmem:[%s302_s0] sm:$0xff]  ;;  %161 = vmatpush.xpose.msk.msra.mxu1 %vm53_vm1, %v72_v11  ;;  %v71_v12 = vld [vmem:[%s303_s2 + $0x30] sm:$0xff]  ;;  %v70_v13 = vld [vmem:[%s303_s2 + $0x28] sm:$0xff] }
   0x5   :  { %v69_v14 = vld [vmem:[%s303_s2 + $0x20] sm:$0xff]  ;;  %v68_v15 = vld [vmem:[%s303_s2 + $0x18] sm:$0xff]  ;;  %v67_v16 = vld [vmem:[%s303_s2 + $0x10] sm:$0xff] }
   0x6   :  { %43 = vmatpush.msra.mxu0 %v26_v2  ;;  %v66_v22 = vld [vmem:[%s303_s2 + $0x8] sm:$0xff]  ;;  %v65_v23 = vld [vmem:[%s303_s2] sm:$0xff]  ;;  %v127_v24 = vld [vmem:[%s304_s3 + $0x38] sm:$0xff] }
   0x7   :  { %v126_v25 = vld [vmem:[%s304_s3 + $0x30] sm:$0xff]  ;;  %143 = vmatpush.msra.mxu2 %v127_v24  ;;  %v125_v26 = vld [vmem:[%s304_s3 + $0x28] sm:$0xff]  ;;  %v124_v27 = vld [vmem:[%s304_s3 + $0x20] sm:$0xff] }
   0x8   :  { %44 = vmatpush.msra.mxu0 %v25_v3  ;;  %162 = vmatpush.xpose.msk.msra.mxu1 %vm53_vm1, %v71_v12  ;;  %v123_v28 = vld [vmem:[%s304_s3 + $0x18] sm:$0xff]  ;;  %v122_v29 = vld [vmem:[%s304_s3 + $0x10] sm:$0xff]  ;;  %v121_v30 = vld [vmem:[%s304_s3 + $0x8] sm:$0xff] }
   0x9   :  { %144 = vmatpush.msra.mxu2 %v126_v25  ;;  %v120_v34 = vld [vmem:[%s304_s3] sm:$0xff] }
   0xa   :  { %45 = vmatpush.msra.mxu0 %v24_v4  ;;  %v171_v36 = vld [vmem:[%s305_s4] ss:$0 sm:$0xff] }
   0xb   :  { %145 = vmatpush.msra.mxu2 %v125_v26 }
   0xc   :  { %46 = vmatpush.msra.mxu0 %v23_v5  ;;  %163 = vmatpush.xpose.msk.msra.mxu1 %vm53_vm1, %v70_v13 }
   0xd   :  { %146 = vmatpush.msra.mxu2 %v124_v27 }
   0xe   :  { %47 = vmatpush.msra.mxu0 %v22_v6 }
   0xf   :  { %147 = vmatpush.msra.mxu2 %v123_v28 }
  0x10   :  { %48 = vmatpush.msra.mxu0 %v21_v7  ;;  %164 = vmatpush.xpose.msk.msra.mxu1 %vm53_vm1, %v69_v14 }
  0x11   :  { %160 = vmatmul.msk.f32.vlgmr.msra.gmra.mxu0 %vm29_vm0, %v20_v8  ;;  %148 = vmatpush.msra.mxu2 %v122_v29 }
  0x13   :  { %149 = vmatpush.msra.mxu2 %v121_v30 }
  0x14   :  { %165 = vmatpush.xpose.msk.msra.mxu1 %vm53_vm1, %v68_v15 }
  0x15   :  { %150 = vmatpush.msra.mxu2 %v120_v34 }
  0x18   :  { %166 = vmatpush.xpose.msk.msra.mxu1 %vm53_vm1, %v67_v16 }
  0x1c   :  { %167 = vmatpush.xpose.msk.msra.mxu1 %vm53_vm1, %v66_v22 }
  0x20   :  { %168 = vmatpush.xpose.msk.msra.mxu1 %vm53_vm1, %v65_v23 }
  0x8e   :  { %v50_v9 = vpop.f32.mrf.mxu0 }
  0x8f   :  { %v54_v10 = vsel %vm53_vm1, %v50_v9, -inf }
  0x90   :  { %55 = vmax.xlane.f32.xlu0 %v54_v10 }
 0x103   :  { %v56_v17 = vpop.xlane.xlu0 %55 }
 0x104   :  { %v57_v18 = vsub.f32 %v50_v9, %v56_v17 }
 0x106   :  { %v58_v19 = vmul.f32 1.442695, %v57_v18 }
 0x108   :  { %172 = vpow2.f32 %v58_v19 }
 0x10e   :  { %v173_v20 = vpop.eup %172 }
 0x10f   :  { %v60_v21 = vsel %vm53_vm1, %v173_v20, 0.0 }
 0x110   :  { %61 = vadd.xlane.f32.xlu0 %v60_v21 }
 0x183   :  { %v62_v31 = vpop.xlane.xlu0 %61 }
 0x184   :  { %174 = vrcp.f32 %v62_v31 }
 0x18a   :  { %v175_v32 = vpop.eup %174 }
 0x18b   :  { %v64_v33 = vmul.f32 %v175_v32, %v173_v20 }
 0x18d   :  { %169 = vmatmul.msk.f32.vlgmr.msra.gmra.mxu1 %vm53_vm1, %v64_v33 }
 0x20a   :  { %v117_v35 = vpop.f32.mrf.mxu1 }
 0x20b   :  { %170 = vmatmul.msk.f32.vlgmr.msra.gmra.mxu2 %vm29_vm0, %v117_v35 }
 0x28e   :  { %v152_v37 = vpop.f32.mrf.mxu2 }
 0x28f   :  { %v153_v38 = vadd.f32 %v171_v36, %v152_v37 }
 0x291   :  { %155 = vst.msk [vmem:[%s306_s5] sm:$0xff] %vm29_vm0, %v153_v38 }

</bundles_post_ra>
